<compile_context>
chip_gen: v6e
topology: v6e:2x2x1
jax: 0.10.0
libtpu: 0.0.40
codegen_flags: <defaults>
</compile_context>

<pallas_src>
import functools

import jax
import jax.numpy as jnp
from jax.experimental import pallas as pl
from jax.experimental.pallas import tpu as pltpu

_LANES = 128
_SUBLANES = 8
_VMEM_LIMIT = 32 * 1024 * 1024  # safe on v5e/v6e (128 MiB phys) and v7x (64 MiB)


# --------------------------------------------------------------------------
# Tile-size selection: biggest row tile that fits a conservative VMEM budget
# (double-buffered inputs + f32 compute copies + lane-padded narrow columns).
# --------------------------------------------------------------------------
def _pick_tile(extent, num_classes, *, extra_narrow_cols=1,
               max_rows=4096, budget_bytes=2 * 1024 * 1024):
    # f32 compute row of the logits + each (rows, 1) column (targets / scale)
    # occupies a full 128-lane row in VMEM (512 B per row).
    bytes_per_row = num_classes * 4 + extra_narrow_cols * _LANES * 4
    rows = budget_bytes // max(1, bytes_per_row)
    rows = max(_SUBLANES, (rows // _SUBLANES) * _SUBLANES)  # multiple of 8
    rows = min(rows, max_rows)
    if extent <= rows:
        return extent            # full extent: always a legal block shape
    return rows                  # ragged last tile handled by masking


# --------------------------------------------------------------------------
# Shared per-row loss (no masking; masking applied AFTER so garbage from a
# ragged last tile never leaks into the reduction).
# --------------------------------------------------------------------------
def _raw_losses(em, tgt):
    """em: (..., C) f32 logits; tgt: (..., 1) int32. Returns (..., 1) losses."""
    C = em.shape[-1]
    m = jnp.max(em, axis=-1, keepdims=True)
    lse = m + jnp.log(jnp.sum(jnp.exp(em - m), axis=-1, keepdims=True))
    iota_shape = (1,) * (em.ndim - 1) + (C,)
    cls = jax.lax.broadcasted_iota(jnp.int32, iota_shape, em.ndim - 1)
    tgt_logit = jnp.sum(jnp.where(cls == tgt, em, 0.0), axis=-1, keepdims=True)
    return lse - tgt_logit


def _tile_scalar(x):
    """Broadcast a scalar to a lane-dense (1, 8, 128) output block."""
    return jnp.broadcast_to(x.reshape(1, 1, 1), (1, _SUBLANES, _LANES))


# --------------------------------------------------------------------------
# Kernels
# --------------------------------------------------------------------------
def _ce_sum_kernel(em_ref, tgt_ref, out_ref, *, rows_total, block_rows,
                   mask_rows):
    """'standard': per-tile partial sum over flattened rows."""
    em = em_ref[...].astype(jnp.float32)                   # (TR, C)
    tgt = tgt_ref[...]                                     # (TR, 1) int32
    loss = _raw_losses(em, tgt)                            # (TR, 1)
    valid = tgt != 0
    if mask_rows:                                          # static (ragged tile)
        row_ids = (pl.program_id(0) * block_rows
                   + jax.lax.broadcasted_iota(jnp.int32, (block_rows, 1), 0))
        valid = valid & (row_ids < rows_total)
    loss = jnp.where(valid, loss, 0.0)
    out_ref[...] = _tile_scalar(jnp.sum(loss))


def _ce_weighted_kernel(em_ref, tgt_ref, scale_ref, out_ref, *, rows_total,
                        block_rows, mask_rows):
    """'weighted': per-tile partial sum of loss * (mask * weight)."""
    em = em_ref[...].astype(jnp.float32)                   # (TR, C)
    tgt = tgt_ref[...]                                     # (TR, 1)
    loss = _raw_losses(em, tgt) * scale_ref[...]           # (TR, 1)
    valid = tgt != 0
    if mask_rows:
        row_ids = (pl.program_id(0) * block_rows
                   + jax.lax.broadcasted_iota(jnp.int32, (block_rows, 1), 0))
        valid = valid & (row_ids < rows_total)
    loss = jnp.where(valid, loss, 0.0)
    out_ref[...] = _tile_scalar(jnp.sum(loss))


def _ce_per_sample_kernel(em_ref, tgt_ref, out_ref, *, seq_len, block_t,
                          mask_cols):
    """'per_sample': resident per-batch-row accumulator over the T-tile axis."""
    t = pl.program_id(1)

    @pl.when(t == 0)
    def _():
        out_ref[...] = jnp.zeros_like(out_ref)

    em = em_ref[...].astype(jnp.float32)                   # (1, TT, C)
    tgt = tgt_ref[...]                                     # (1, TT, 1)
    loss = _raw_losses(em, tgt)                            # (1, TT, 1)
    valid = tgt != 0
    if mask_cols:
        col_ids = (t * block_t
                   + jax.lax.broadcasted_iota(jnp.int32, (1, block_t, 1), 1))
        valid = valid & (col_ids < seq_len)
    loss = jnp.where(valid, loss, 0.0)
    out_ref[...] += _tile_scalar(jnp.sum(loss))


# --------------------------------------------------------------------------
# Wrapper
# --------------------------------------------------------------------------
def cross_entropy_loss_wrap(emissions, targets, masks=None, weights=None,
                            *, num_labels, option="standard",
                            block_rows=None, block_t=None):
    """Pallas equivalent of CrossEntropyLossWrap.forward."""
    B, T, C = emissions.shape
    assert C == num_labels, "last dim of emissions must be num_labels"
    tgt32 = targets.astype(jnp.int32)

    if option in ("standard", "weighted"):
        R = B * T
        extra = 2 if option == "weighted" else 1
        TR = block_rows if block_rows is not None else _pick_tile(
            R, C, extra_narrow_cols=extra)
        nt = pl.cdiv(R, TR)
        mask_rows = (nt * TR != R)
        em2 = emissions.reshape(R, C)                      # native dtype
        tgt2 = tgt32.reshape(R, 1)

        em_spec = pl.BlockSpec((TR, C), lambda r: (r, 0))
        tgt_spec = pl.BlockSpec((TR, 1), lambda r: (r, 0))
        out_spec = pl.BlockSpec((1, _SUBLANES, _LANES), lambda r: (r, 0, 0))
        out_shape = jax.ShapeDtypeStruct((nt, _SUBLANES, _LANES), jnp.float32)
        cp = pltpu.CompilerParams(dimension_semantics=("parallel",),
                                  vmem_limit_bytes=_VMEM_LIMIT)

        if option == "standard":
            partials = pl.pallas_call(
                functools.partial(_ce_sum_kernel, rows_total=R,
                                  block_rows=TR, mask_rows=mask_rows),
                out_shape=out_shape, grid=(nt,),
                in_specs=[em_spec, tgt_spec],
                out_specs=out_spec, compiler_params=cp,
            )(em2, tgt2)
        else:  # weighted
            # (B, T) elementwise op on a tiny side tensor (1/C of the logits
            # traffic); kept in the wrapper to keep the kernel simple.
            scale = (masks.astype(jnp.float32)
                     * weights.reshape(B, 1).astype(jnp.float32)).reshape(R, 1)
            partials = pl.pallas_call(
                functools.partial(_ce_weighted_kernel, rows_total=R,
                                  block_rows=TR, mask_rows=mask_rows),
                out_shape=out_shape, grid=(nt,),
                in_specs=[em_spec, tgt_spec,
                          pl.BlockSpec((TR, 1), lambda r: (r, 0))],
                out_specs=out_spec, compiler_params=cp,
            )(em2, tgt2, scale)
        return jnp.sum(partials[:, 0, 0])

    elif option == "per_sample":
        TT = block_t if block_t is not None else _pick_tile(
            T, C, extra_narrow_cols=1)
        ntt = pl.cdiv(T, TT)
        mask_cols = (ntt * TT != T)
        tgt3 = tgt32.reshape(B, T, 1)
        out = pl.pallas_call(
            functools.partial(_ce_per_sample_kernel, seq_len=T, block_t=TT,
                              mask_cols=mask_cols),
            out_shape=jax.ShapeDtypeStruct((B, _SUBLANES, _LANES), jnp.float32),
            grid=(B, ntt),
            in_specs=[pl.BlockSpec((1, TT, C), lambda b, t: (b, t, 0)),
                      pl.BlockSpec((1, TT, 1), lambda b, t: (b, t, 0))],
            out_specs=pl.BlockSpec((1, _SUBLANES, _LANES),
                                   lambda b, t: (b, 0, 0)),
            compiler_params=pltpu.CompilerParams(
                dimension_semantics=("parallel", "arbitrary"),
                vmem_limit_bytes=_VMEM_LIMIT),
        )(emissions, tgt3)
        return out[:, 0, 0]                                # (B,)

    else:
        # Matches the PyTorch module's fallthrough `return 0`.
        return jnp.float32(0.0)


# ------------------------- pure-JAX reference ------------------------------
def _ref(emissions, targets, option, masks=None, weights=None):
    B, T, C = emissions.shape
    logits = emissions.reshape(-1, C).astype(jnp.float32)
    t = targets.reshape(-1).astype(jnp.int32)
    lse = jax.scipy.special.logsumexp(logits, axis=-1)
    tgt_logit = jnp.take_along_axis(logits, t[:, None], axis=1)[:, 0]
    per = jnp.where(t != 0, lse - tgt_logit, 0.0)
    if option == "standard":
        return jnp.sum(per)
    if option == "per_sample":
        return per.reshape(B, T).sum(axis=-1)
    if option == "weighted":
        per = per.reshape(B, T)
        return jnp.sum(per * masks.astype(jnp.float32)
                       * weights.reshape(B, 1).astype(jnp.float32))
    return jnp.float32(0.0)


def _check(emissions, targets, masks, weights, C, **tile_kwargs):
    ok = True
    for option in ("standard", "per_sample", "weighted"):
        got = cross_entropy_loss_wrap(
            emissions, targets, masks=masks, weights=weights,
            num_labels=C, option=option, **tile_kwargs)
        got = jax.block_until_ready(got)
        want = _ref(emissions, targets, option, masks=masks, weights=weights)
        if not jnp.allclose(got, want, atol=1e-4, rtol=1e-4):
            ok = False
            print(f"MISMATCH option={option} tiles={tile_kwargs}: "
                  f"got={got} want={want}")
    return ok


if __name__ == "__main__":
    key = jax.random.PRNGKey(0)
    ok = True

    # Case 1: small shapes, single tile per grid axis.
    B, T, C = 2, 8, 16
    k1, k2, k3, k4 = jax.random.split(key, 4)
    emissions = jax.random.normal(k1, (B, T, C), dtype=jnp.float32)
    targets = jax.random.randint(k2, (B, T), minval=0, maxval=C, dtype=jnp.int32)
    masks = (jax.random.uniform(k3, (B, T)) > 0.3).astype(jnp.float32)
    weights = jax.random.uniform(k4, (B,), dtype=jnp.float32)
    ok &= _check(emissions, targets, masks, weights, C)

    # Case 2: ragged tiles (forced small blocks) to exercise row/col masking.
    B2, T2, C2 = 2, 9, 16
    k5, k6, k7, k8 = jax.random.split(jax.random.PRNGKey(1), 4)
    emissions2 = jax.random.normal(k5, (B2, T2, C2), dtype=jnp.bfloat16)
    targets2 = jax.random.randint(k6, (B2, T2), minval=0, maxval=C2,
                                  dtype=jnp.int32)
    masks2 = (jax.random.uniform(k7, (B2, T2)) > 0.3).astype(jnp.float32)
    weights2 = jax.random.uniform(k8, (B2,), dtype=jnp.float32)
    ok &= _check(emissions2, targets2, masks2, weights2, C2,
                 block_rows=8, block_t=8)

    if ok:
        print("KERNEL_OK")
</pallas_src>

<mosaic_0001>
module attributes {stable_mosaic.version = 11 : i64} {
  func.func @_ce_sum_kernel(%arg0: i32, %arg1: memref<16x16xf32, #tpu.memory_space<vmem>>, %arg2: memref<16x1xi32, #tpu.memory_space<vmem>>, %arg3: memref<1x8x128xf32, #tpu.memory_space<vmem>>) attributes {dimension_semantics = [#tpu.dimension_semantics<parallel>], iteration_bounds = array<i64: 1>, scalar_prefetch = 0 : i64, scratch_operands = 0 : i64, tpu.core_type = #tpu.core_type<tc>, window_params = [{transform_indices = @transform_0, window_bounds = array<i64: 16, 16>}, {transform_indices = @transform_1, window_bounds = array<i64: 16, 1>}, {transform_indices = @transform_2, window_bounds = array<i64: 1, 8, 128>}]} {
    %c0 = arith.constant 0 : index
    %c0_0 = arith.constant 0 : index
    %0 = vector.load %arg1[%c0, %c0_0] : memref<16x16xf32, #tpu.memory_space<vmem>>, vector<16x16xf32>
    %c0_1 = arith.constant 0 : index
    %c0_2 = arith.constant 0 : index
    %1 = vector.load %arg2[%c0_1, %c0_2] : memref<16x1xi32, #tpu.memory_space<vmem>>, vector<16x1xi32>
    %cst = arith.constant dense<0xFF800000> : vector<16xf32>
    %2 = vector.multi_reduction <maximumf>, %0, %cst [1] : vector<16x16xf32> to vector<16xf32>
    %3 = vector.shape_cast %2 : vector<16xf32> to vector<16x1xf32>
    %4 = vector.broadcast %3 : vector<16x1xf32> to vector<16x16xf32>
    %5 = arith.subf %0, %4 : vector<16x16xf32>
    %6 = math.exp %5 : vector<16x16xf32>
    %cst_3 = arith.constant dense<0.000000e+00> : vector<16xf32>
    %7 = vector.multi_reduction <add>, %6, %cst_3 [1] : vector<16x16xf32> to vector<16xf32>
    %8 = vector.shape_cast %7 : vector<16xf32> to vector<16x1xf32>
    %9 = math.log %8 : vector<16x1xf32>
    %10 = arith.addf %3, %9 : vector<16x1xf32>
    %11 = tpu.iota {dimensions = array<i32: 1>} : vector<1x16xi32>
    %12 = vector.broadcast %11 : vector<1x16xi32> to vector<16x16xi32>
    %13 = vector.broadcast %1 : vector<16x1xi32> to vector<16x16xi32>
    %14 = arith.cmpi eq, %12, %13 : vector<16x16xi32>
    %cst_4 = arith.constant 0.000000e+00 : f32
    %15 = vector.broadcast %cst_4 : f32 to vector<16x16xf32>
    %16 = arith.select %14, %0, %15 : vector<16x16xi1>, vector<16x16xf32>
    %cst_5 = arith.constant dense<0.000000e+00> : vector<16xf32>
    %17 = vector.multi_reduction <add>, %16, %cst_5 [1] : vector<16x16xf32> to vector<16xf32>
    %18 = vector.shape_cast %17 : vector<16xf32> to vector<16x1xf32>
    %19 = arith.subf %10, %18 : vector<16x1xf32>
    %c0_i32 = arith.constant 0 : i32
    %20 = vector.broadcast %c0_i32 : i32 to vector<16x1xi32>
    %21 = arith.cmpi ne, %1, %20 : vector<16x1xi32>
    %cst_6 = arith.constant 0.000000e+00 : f32
    %22 = vector.broadcast %cst_6 : f32 to vector<16x1xf32>
    %23 = arith.select %21, %19, %22 : vector<16x1xi1>, vector<16x1xf32>
    %24 = vector.shape_cast %23 : vector<16x1xf32> to vector<1x16x1xf32>
    %cst_7 = arith.constant dense<0.000000e+00> : vector<1xf32>
    %25 = vector.multi_reduction <add>, %24, %cst_7 [1, 2] : vector<1x16x1xf32> to vector<1xf32>
    %26 = vector.shape_cast %25 : vector<1xf32> to vector<1x1x1xf32>
    %27 = vector.extract %26[0, 0, 0] : f32 from vector<1x1x1xf32>
    %28 = vector.broadcast %27 : f32 to vector<1x1x1xf32>
    %29 = vector.shape_cast %28 : vector<1x1x1xf32> to vector<1x1x1xf32>
    %30 = vector.broadcast %29 : vector<1x1x1xf32> to vector<1x8x128xf32>
    %c0_8 = arith.constant 0 : index
    %c0_9 = arith.constant 0 : index
    %c0_10 = arith.constant 0 : index
    %31 = vector.load %arg3[%c0_8, %c0_9, %c0_10] : memref<1x8x128xf32, #tpu.memory_space<vmem>>, vector<1x8x128xf32>
    tpu.vector_store %arg3[%c0_8, %c0_9, %c0_10], %30 {strides = array<i32>} : memref<1x8x128xf32, #tpu.memory_space<vmem>>, vector<1x8x128xf32>,
    return
  }
  func.func @transform_0(%arg0: i32) -> (i32, i32) {
    %c0_i32 = arith.constant 0 : i32
    %c0_i32_0 = arith.constant 0 : i32
    return %arg0, %c0_i32 : i32, i32
  }
  func.func @transform_1(%arg0: i32) -> (i32, i32) {
    %c0_i32 = arith.constant 0 : i32
    %c0_i32_0 = arith.constant 0 : i32
    return %arg0, %c0_i32 : i32, i32
  }
  func.func @transform_2(%arg0: i32) -> (i32, i32, i32) {
    %c0_i32 = arith.constant 0 : i32
    %c0_i32_0 = arith.constant 0 : i32
    %c0_i32_1 = arith.constant 0 : i32
    return %arg0, %c0_i32, %c0_i32_0 : i32, i32, i32
  }
}

</mosaic_0001>

<bundles_post_ra>
// kernel: tpu_custom_call.1
= control target key start
LH: loop header
LB: loop body
LE: loop exit
PB: predicated region body
PF: predicated region fallthrough
CT: control target
= control target key end

     0   :  { %vm16_vm0 = vcmask 130048   ;;  %v130_v4 = vmov 0   ;;  %s168_s0 = inlined_call_operand.vmem [shape: f32[16,16], index: 0, kind: input, shape index: {}]   ;;  %s169_s1 = inlined_call_operand.vmem [shape: s32[16,1], index: 1, kind: input, shape index: {}]   ;;  %s170_s2 = inlined_call_operand.hbm [shape: f32[1,8,128], index: 2, kind: output, shape index: {}]  }
   0x1   :  { %v12_v0 = vld [vmem:[%s168_s0] sm:$0xff]  ;;  %v13_v1 = vld [vmem:[%s168_s0 + $0x8] sm:$0xff]  ;;  %98 = vset.pattern.permute.xlu1 %v130_v4  ;;  %99 = vset.pattern.permute.xlu0 %v130_v4 }
   0x2   :  { %v14_v2 = vld [vmem:[%s169_s1] sm:$0xff]  ;;  %v17_v3 = vsel %vm16_vm0, %v12_v0, -inf }
   0x3   :  { %7 = vsyncpa [#allocation3], 0  ;;  %18 = vmax.xlane.f32.xlu0 %v17_v3  ;;  %44 = vperm.xlu1 %98, %v14_v2   ;;  %v20_v5 = vsel %vm16_vm0, %v13_v1, -inf  ;;  %v15_v6 = vld [vmem:[%s169_s1 + $0x8] sm:$0xff]  ;;  %v41_v13 = vlaneseq  ;;  %vm61_vm3 = vcmp.ne.s32.totalorder %v14_v2, 0  ;;  %vm65_vm5 = vcmask 7168  }
   0x4   :  { %vm62_vm4 = vcmp.ne.s32.totalorder %v15_v6, 0  ;;  %s131_s0 = smov [#allocation2]  }
   0x5   :  { %v42_v15 = vand.u32 127, %v41_v13  ;;  %s86_s1 = sshll.u32 %s131_s0, 4  ;;  %s87_s1 = int_to_ptr.vmem [resolvable:$true] %s86_s1 }
   0x6   :  { %s108_s18 = scalar_lea.vmem %s87_s1, 128  ;;  %p113_p1 = scmp.lt.s32.totalorder %s87_s1, %s87_s1 }
   0x7   :  { %21 = vmax.xlane.f32.xlu0 %v20_v5  ;;  %47 = vperm.xlu1 %98, %v15_v6   ;;  %p109_p0 = scmp.ne.s32.totalorder %s87_s1, %s108_s18  ;;  %p114_p2 = scmp.lt.s32.totalorder %s108_s18, %s108_s18 }
   0x9   :  { %p115_p3 = por %p114_p2, %p113_p1 }
   0xb   :  { %p116_p4 = pnand %p115_p3, %p109_p0 }
  0x7e   :  { %v45_v14 = vpop.permute.xlu1 %44 }
  0x7f   :  { %vm49_vm1 = vcmp.eq.s32.totalorder %v42_v15, %v45_v14 }
  0x80   :  { %v51_v18 = vsel %vm49_vm1, %v12_v0, 0.0 }
  0x81   :  { %v53_v20 = vsel %vm16_vm0, %v51_v18, 0.0 }
  0x82   :  { %v48_v16 = vpop.permute.xlu1 %47 }
  0x83   :  { %vm50_vm2 = vcmp.eq.s32.totalorder %v42_v15, %v48_v16 }
  0x84   :  { %v52_v22 = vsel %vm50_vm2, %v13_v1, 0.0 }
  0x85   :  { %v56_v24 = vsel %vm16_vm0, %v52_v22, 0.0 }
  0x8c   :  { %v19_v7 = vpop.xlane.xlu0 %18 }
  0x8d   :  { %v23_v8 = vsub.f32 %v12_v0, %v19_v7 }
  0x8f   :  { %v25_v9 = vmul.f32 1.442695, %v23_v8 }
  0x90   :  { %v22_v10 = vpop.xlane.xlu0 %21 }
  0x91   :  { %100 = vpow2.f32 %v25_v9  ;;  %v24_v11 = vsub.f32 %v13_v1, %v22_v10 }
  0x93   :  { %v27_v12 = vmul.f32 1.442695, %v24_v11 }
  0x95   :  { %102 = vpow2.f32 %v27_v12 }
  0x9e   :  { %v101_v17 = vpop.eup %100 }
  0x9f   :  { %v29_v19 = vsel %vm16_vm0, %v101_v17, 0.0 }
  0xa0   :  { %30 = vadd.xlane.f32.xlu0 %v29_v19 }
  0xa2   :  { %v103_v21 = vpop.eup %102 }
  0xa3   :  { %v32_v23 = vsel %vm16_vm0, %v103_v21, 0.0 }
  0xa4   :  { %33 = vadd.xlane.f32.xlu1 %v32_v23  ;;  %54 = vadd.xlane.f32.xlu0 %v53_v20 }
  0xa8   :  { %57 = vadd.xlane.f32.xlu0 %v56_v24 }
 0x129   :  { %v31_v25 = vpop.xlane.xlu0 %30 }
 0x12a   :  { %104 = vlog2.f32 %v31_v25 }
 0x12d   :  { %v34_v26 = vpop.xlane.xlu1 %33  ;;  %v55_v29 = vpop.xlane.xlu0 %54 }
 0x12e   :  { %106 = vlog2.f32 %v34_v26 }
 0x131   :  { %v58_v35 = vpop.xlane.xlu0 %57 }
 0x137   :  { %v105_v27 = vpop.eup %104 }
 0x138   :  { %v36_v28 = vmul.f32 0.6931472, %v105_v27 }
 0x13a   :  { %v39_v30 = vadd.f32 %v36_v28, %v19_v7 }
 0x13b   :  { %v107_v31 = vpop.eup %106 }
 0x13c   :  { %v38_v32 = vmul.f32 0.6931472, %v107_v31  ;;  %v59_v33 = vsub.f32 %v39_v30, %v55_v29 }
 0x13e   :  { %v40_v34 = vadd.f32 %v38_v32, %v22_v10  ;;  %v63_v36 = vsel %vm61_vm3, %v59_v33, 0.0 }
 0x13f   :  { %v66_v39 = vsel %vm65_vm5, %v63_v36, 0.0 }
 0x140   :  { %v60_v37 = vsub.f32 %v40_v34, %v58_v35 }
 0x142   :  { %v64_v38 = vsel %vm62_vm4, %v60_v37, 0.0 }
 0x143   :  { %v67_v40 = vsel %vm65_vm5, %v64_v38, 0.0 }
 0x144   :  { %v68_v41 = vadd.f32 %v67_v40, %v66_v39 }
 0x146   :  { %69 = vadd.xlane.f32.xlu0 %v68_v41 }
 0x1cf   :  { %v70_v42 = vpop.xlane.xlu0 %69 }
 0x1d0   :  { %v71_v43 = vrot.slane %v70_v42, 4 }
 0x1d2   :  { %v72_v44 = vadd.f32 %v71_v43, %v70_v42 }
 0x1d4   :  { %v73_v45 = vrot.slane %v72_v44, 2 }
 0x1d6   :  { %v74_v46 = vadd.f32 %v73_v45, %v72_v44 }
 0x1d8   :  { %v75_v47 = vrot.slane %v74_v46, 1 }
 0x1da   :  { %v76_v48 = vadd.f32 %v75_v47, %v74_v46 }
 0x1dc   :  { %94 = vpush %v76_v48 }
 0x20d   :  { %s95_s17 = spop %94 }
 0x20e   :  { %v78_v49 = vstv %s95_s17 }
 0x20f   :  { %79 = vst [vmem:[#allocation2] sm:$0xff] %v78_v49 }
 0x210   :  { %119 = shalt.err (!%p116_p4)
}
 0x211   :  { %89 = dma.vmem_to_hbm [thread:$0]  %s87_s1, 128, %s170_s2, [#allocation3]  }
 0x212   :  { %128 = dma.done.wait [#allocation3], 128  }
 0x213   :  { %129 = vsyncadd [#allocation3], 4294967168 }
 0x214   :  { %93 = vsyncpa [#allocation3], 1 }

</bundles_post_ra>
